<compile_context>
chip_gen: v5e
topology: v5e:2x2
jax: 0.10.0
libtpu: 0.0.40
codegen_flags: <defaults>
</compile_context>

<pallas_src>
import functools

import jax
import jax.numpy as jnp
from jax.experimental import pallas as pl
from jax.experimental.pallas import tpu as pltpu


# --------------------------------------------------------------------------- #
# Kernel
# --------------------------------------------------------------------------- #
def _mha_kernel(q_ref, k_ref, v_ref, o_ref, q_sc, m_sc, l_sc, acc_sc,
                *, heads, scale, j_valid, kv_block, pad_kv, exp_dtype):
    """One (batch-group, kv-block) grid step.

    q_ref : (G, I, dim)   resident across the kv axis
    k_ref : (G, Tk, dim)  current kv block
    v_ref : (G, Tk, dim)  current kv block
    o_ref : (G, I, dim)   lane-dense output (written on the last kv step)
    q_sc  : (G, I, dim)   scaled Q, compute dtype (written once at kv == 0)
    m_sc  : (G, I, heads) f32 running row max   (heads on lanes)
    l_sc  : (G, I, heads) f32 running denominator
    acc_sc: (G, I, dim)   f32 running numerator (lane-dense)
    """
    kv = pl.program_id(1)
    G, I, dim = q_ref.shape
    d = dim // heads

    @pl.when(kv == 0)
    def _init():
        # Fold the softmax scale into Q once per batch group (not per kv step).
        q_sc[...] = q_ref[...] * jnp.asarray(scale, dtype=q_ref.dtype)
        m_sc[...] = jnp.full(m_sc.shape, -jnp.inf, dtype=m_sc.dtype)
        l_sc[...] = jnp.zeros(l_sc.shape, dtype=l_sc.dtype)
        acc_sc[...] = jnp.zeros(acc_sc.shape, dtype=acc_sc.dtype)

    q = q_sc[...]            # (G, I, dim), already scaled / in compute dtype
    k = k_ref[...]           # (G, Tk, dim)
    v = v_ref[...]           # (G, Tk, dim)

    if pad_kv:
        # Mask padded key positions (only emitted when padding exists).
        j_pos = kv * kv_block + jax.lax.broadcasted_iota(
            jnp.int32, (1, 1, kv_block), 2)
        valid = j_pos < j_valid                                 # (1, 1, Tk)

    m_all = m_sc[...]        # (G, I, heads) f32
    l_all = l_sc[...]

    m_news, l_news, alphas, pvs = [], [], [], []
    for h in range(heads):   # small, fully unrolled; 1-batch-dim einsums only
        lo = h * d
        q_h = q[:, :, lo:lo + d]                                # (G, I, d)
        k_h = k[:, :, lo:lo + d]                                # (G, Tk, d)
        v_h = v[:, :, lo:lo + d]                                # (G, Tk, d)

        # Scores: contract last dims directly, accumulate in f32 on the MXU.
        s = jnp.einsum('gid,gjd->gij', q_h, k_h,
                       preferred_element_type=jnp.float32)      # (G, I, Tk)
        if pad_kv:
            s = jnp.where(valid, s, jnp.float32(-1e30))

        # Online (streaming) softmax; statistics in f32.
        m_prev = m_all[:, :, h:h + 1]                           # (G, I, 1)
        l_prev = l_all[:, :, h:h + 1]
        m_new = jnp.maximum(m_prev, jnp.max(s, axis=-1, keepdims=True))
        alpha = jnp.exp(m_prev - m_new)                         # (G, I, 1)
        # exp emitted directly in the compute dtype (bf16 on v6e/v7x paths);
        # p then feeds the PV matmul with no separate cast.
        p = jnp.exp((s - m_new).astype(exp_dtype))              # (G, I, Tk)
        l_new = alpha * l_prev + jnp.sum(p.astype(jnp.float32),
                                         axis=-1, keepdims=True)

        pv = jnp.einsum('gij,gjd->gid', p.astype(v_h.dtype), v_h,
                        preferred_element_type=jnp.float32)     # (G, I, d)

        m_news.append(m_new)
        l_news.append(l_new)
        alphas.append(jnp.broadcast_to(alpha, (G, I, d)))
        pvs.append(pv)

    # Single (lane-concatenated) store per statistic and ONE dense accumulator
    # read-modify-write per kv step, instead of `heads` narrow masked stores.
    m_sc[...] = jnp.concatenate(m_news, axis=-1)
    l_sc[...] = jnp.concatenate(l_news, axis=-1)
    acc_sc[...] = (jnp.concatenate(alphas, axis=-1) * acc_sc[...]
                   + jnp.concatenate(pvs, axis=-1))

    @pl.when(kv == pl.num_programs(1) - 1)
    def _finalize():
        l_fin = l_sc[...]
        inv = [jnp.broadcast_to(
                   pl.reciprocal(l_fin[:, :, h:h + 1], approx=True), (G, I, d))
               for h in range(heads)]
        o_ref[...] = (acc_sc[...] * jnp.concatenate(inv, axis=-1)
                      ).astype(o_ref.dtype)


# --------------------------------------------------------------------------- #
# Tiling heuristics
# --------------------------------------------------------------------------- #
def _largest_divisor_leq(n, cap):
    cap = int(max(1, min(n, cap)))
    for g in range(cap, 0, -1):
        if n % g == 0:
            return g
    return 1


def _vmem_capacity_bytes(default=64 * 1024 * 1024):
    """Per-core VMEM capacity; conservative (v7x-sized) fallback."""
    try:
        info = pltpu.get_tpu_info()
        cap = int(getattr(info, "vmem_capacity_bytes", default))
        return cap if cap > 0 else default
    except Exception:
        return default


def _choose_batch_group(B, I, Tk, dim, heads, comp_isz, out_isz, budget_bytes):
    """Batches per grid step within a generation-aware VMEM budget."""
    per_g = (
        2 * I * dim * comp_isz          # double-buffered Q input block
        + 2 * I * dim * out_isz         # double-buffered O output block
        + 2 * 2 * Tk * dim * comp_isz   # double-buffered K and V blocks
        + I * dim * comp_isz            # scaled-Q scratch
        + I * dim * 4                   # f32 accumulator scratch
        + 2 * I * 128 * 4               # m/l scratch (lane-padded to 128)
        + I * Tk * 4                    # one head's f32 score/prob tile at a time
        + 2 * I * dim * 4               # concatenated alpha/pv register working set
    )
    cap = budget_bytes // max(per_g, 1)
    cap = min(cap, max(1, B // 2))      # keep >= 2 batch grid steps (v7x megacore)
    return _largest_divisor_leq(B, int(cap))


# --------------------------------------------------------------------------- #
# Wrapper
# --------------------------------------------------------------------------- #
def multi_head_attention(Q, K, V, *, dim, heads, kv_block=None, batch_group=None,
                         compute_dtype=None, max_kv_block=512):
    """Pallas TPU implementation of MultiHeadAttention.forward.

    Q: (B, I, dim), K: (B, J, dim), V: (B, J, dim)  ->  (B, I, dim)
    """
    B, I, dq = Q.shape
    Bk, J, dk = K.shape
    assert dq == dim and dk == dim and V.shape == (Bk, J, dim) and Bk == B
    assert dim % heads == 0
    d = dim // heads
    scale = float((dim / heads) ** (-0.5))

    out_dtype = Q.dtype
    compute_dtype = jnp.dtype(compute_dtype) if compute_dtype is not None \
        else jnp.dtype(Q.dtype)
    if Q.dtype != compute_dtype:
        # Wrapper-side cast: halves HBM bytes and feeds the MXU natively.
        Q, K, V = (x.astype(compute_dtype) for x in (Q, K, V))
    # bf16 exp on v6e/v7x paths; f32 exp in the (default) f32 path (also v5e-safe).
    exp_dtype = jnp.float32 if compute_dtype == jnp.float32 else compute_dtype

    # kv block: full J if small, otherwise a multiple of 128 (lane-dense scores);
    # ragged tails are zero-padded here and masked in the kernel.
    if kv_block is None:
        kv_block = J if J <= max_kv_block else max_kv_block - (max_kv_block % 128)
    assert kv_block == J or kv_block % 128 == 0, \
        "kv_block must be the full key length or a multiple of 128"
    n_kv = pl.cdiv(J, kv_block)
    J_pad = n_kv * kv_block
    pad_kv = J_pad != J
    if pad_kv:
        K = jnp.pad(K, ((0, 0), (0, J_pad - J), (0, 0)))
        V = jnp.pad(V, ((0, 0), (0, J_pad - J), (0, 0)))

    comp_isz = compute_dtype.itemsize
    out_isz = jnp.dtype(out_dtype).itemsize

    vmem_cap = _vmem_capacity_bytes()
    tile_budget = int(vmem_cap * 0.45)
    vmem_limit = int(vmem_cap * 0.75)

    if batch_group is None:
        batch_group = _choose_batch_group(B, I, kv_block, dim, heads,
                                          comp_isz, out_isz, tile_budget)
    assert B % batch_group == 0, "batch_group must divide the batch size"
    G = batch_group

    kernel = functools.partial(
        _mha_kernel, heads=heads, scale=scale, j_valid=J, kv_block=kv_block,
        pad_kv=pad_kv, exp_dtype=exp_dtype)

    cost = pl.CostEstimate(
        flops=4 * B * heads * I * J * d,
        transcendentals=B * heads * I * J,
        bytes_accessed=(B * I * dim * (comp_isz + out_isz)
                        + 2 * B * J_pad * dim * comp_isz),
    )

    out = pl.pallas_call(
        kernel,
        out_shape=jax.ShapeDtypeStruct((B, I, dim), out_dtype),
        grid=(B // G, n_kv),
        in_specs=[
            pl.BlockSpec((G, I, dim), lambda b, kv: (b, 0, 0)),
            pl.BlockSpec((G, kv_block, dim), lambda b, kv: (b, kv, 0)),
            pl.BlockSpec((G, kv_block, dim), lambda b, kv: (b, kv, 0)),
        ],
        out_specs=pl.BlockSpec((G, I, dim), lambda b, kv: (b, 0, 0)),
        scratch_shapes=[
            pltpu.VMEM((G, I, dim), compute_dtype),   # scaled Q (once per group)
            pltpu.VMEM((G, I, heads), jnp.float32),   # running max
            pltpu.VMEM((G, I, heads), jnp.float32),   # running denominator
            pltpu.VMEM((G, I, dim), jnp.float32),     # running numerator
        ],
        compiler_params=pltpu.CompilerParams(
            dimension_semantics=("parallel", "arbitrary"),
            vmem_limit_bytes=vmem_limit,
        ),
        cost_estimate=cost,
    )(Q, K, V)
    return out


# --------------------------------------------------------------------------- #
# Pure-JAX reference (mirror of the PyTorch forward) + self-test
# --------------------------------------------------------------------------- #
def _reference_mha(Q, K, V, *, dim, heads):
    B, I, _ = Q.shape
    _, J, _ = K.shape
    d = dim // heads
    scale = (dim / heads) ** (-0.5)
    q = Q.reshape(B, I, heads, d).transpose(0, 2, 1, 3)
    k = K.reshape(B, J, heads, d).transpose(0, 2, 1, 3)
    v = V.reshape(B, J, heads, d).transpose(0, 2, 1, 3)
    dots = jnp.einsum('bhid,bhjd->bhij', q, k) * scale
    attn = jax.nn.softmax(dots, axis=-1)
    out = jnp.einsum('bhij,bhjd->bhid', attn, v)
    return out.transpose(0, 2, 1, 3).reshape(B, I, heads * d)


if __name__ == "__main__":
    B, seq, dim, heads = 2, 16, 32, 4    # head_dim = 8

    key = jax.random.PRNGKey(0)
    k_q, k_k, k_v = jax.random.split(key, 3)
    Q = jax.random.normal(k_q, (B, seq, dim), dtype=jnp.float32)
    K = jax.random.normal(k_k, (B, seq, dim), dtype=jnp.float32)
    V = jax.random.normal(k_v, (B, seq, dim), dtype=jnp.float32)

    ref = _reference_mha(Q, K, V, dim=dim, heads=heads)
    out = jax.block_until_ready(multi_head_attention(Q, K, V, dim=dim, heads=heads))
    assert out.shape == (B, seq, dim)
    # Tolerance covers pl.reciprocal(approx=True) on the softmax denominator.
    assert jnp.allclose(out, ref, atol=5e-3, rtol=5e-3), "mismatch vs reference"

    # Cross-attention shapes with multiple lane-dense kv blocks + masked ragged tail.
    J2 = 192
    K2 = jax.random.normal(k_k, (B, J2, dim), dtype=jnp.float32)
    V2 = jax.random.normal(k_v, (B, J2, dim), dtype=jnp.float32)
    ref2 = _reference_mha(Q, K2, V2, dim=dim, heads=heads)
    out2 = jax.block_until_ready(
        multi_head_attention(Q, K2, V2, dim=dim, heads=heads,
                             kv_block=128, batch_group=1))
    assert jnp.allclose(out2, ref2, atol=5e-3, rtol=5e-3), "mismatch (kv-blocked path)"

    # bf16 MXU-operand path (wrapper-side cast, bf16 exp, no separate P cast).
    out3 = jax.block_until_ready(
        multi_head_attention(Q, K2, V2, dim=dim, heads=heads,
                             compute_dtype=jnp.bfloat16))
    assert out3.dtype == Q.dtype
    assert jnp.allclose(out3, ref2, atol=1e-1, rtol=1e-1), "mismatch (bf16 path)"

    print("KERNEL_OK")
</pallas_src>

<mosaic_0001>
module attributes {stable_mosaic.version = 11 : i64} {
  func.func @_mha_kernel(%arg0: i32, %arg1: i32, %arg2: memref<1x16x32xf32, #tpu.memory_space<vmem>>, %arg3: memref<1x16x32xf32, #tpu.memory_space<vmem>>, %arg4: memref<1x16x32xf32, #tpu.memory_space<vmem>>, %arg5: memref<1x16x32xf32, #tpu.memory_space<vmem>>, %arg6: memref<1x16x32xf32, #tpu.memory_space<vmem>>, %arg7: memref<1x16x4xf32, #tpu.memory_space<vmem>>, %arg8: memref<1x16x4xf32, #tpu.memory_space<vmem>>, %arg9: memref<1x16x32xf32, #tpu.memory_space<vmem>>) attributes {dimension_semantics = [#tpu.dimension_semantics<parallel>, #tpu.dimension_semantics<arbitrary>], iteration_bounds = array<i64: 2, 1>, scalar_prefetch = 0 : i64, scratch_operands = 4 : i64, tpu.core_type = #tpu.core_type<tc>, window_params = [{transform_indices = @transform_0, window_bounds = array<i64: 1, 16, 32>}, {transform_indices = @transform_1, window_bounds = array<i64: 1, 16, 32>}, {transform_indices = @transform_2, window_bounds = array<i64: 1, 16, 32>}, {transform_indices = @transform_3, window_bounds = array<i64: 1, 16, 32>}]} {
    %c0_i32 = arith.constant 0 : i32
    %0 = arith.cmpi eq, %arg1, %c0_i32 : i32
    %1 = arith.extui %0 : i1 to i32
    %c0_i32_0 = arith.constant 0 : i32
    %2 = arith.cmpi ne, %1, %c0_i32_0 : i32
    scf.if %2 {
      %c0_44 = arith.constant 0 : index
      %c0_45 = arith.constant 0 : index
      %c0_46 = arith.constant 0 : index
      %105 = vector.load %arg2[%c0_44, %c0_45, %c0_46] : memref<1x16x32xf32, #tpu.memory_space<vmem>>, vector<1x16x32xf32>
      %cst_47 = arith.constant 0.353553385 : f32
      %106 = vector.broadcast %cst_47 : f32 to vector<1x16x32xf32>
      %107 = arith.mulf %105, %106 : vector<1x16x32xf32>
      %c0_48 = arith.constant 0 : index
      %c0_49 = arith.constant 0 : index
      %c0_50 = arith.constant 0 : index
      %108 = vector.load %arg6[%c0_48, %c0_49, %c0_50] : memref<1x16x32xf32, #tpu.memory_space<vmem>>, vector<1x16x32xf32>
      tpu.vector_store %arg6[%c0_48, %c0_49, %c0_50], %107 {strides = array<i32>} : memref<1x16x32xf32, #tpu.memory_space<vmem>>, vector<1x16x32xf32>,
      %cst_51 = arith.constant 0xFF800000 : f32
      %109 = vector.broadcast %cst_51 : f32 to vector<1x16x4xf32>
      %c0_52 = arith.constant 0 : index
      %c0_53 = arith.constant 0 : index
      %c0_54 = arith.constant 0 : index
      %110 = vector.load %arg7[%c0_52, %c0_53, %c0_54] : memref<1x16x4xf32, #tpu.memory_space<vmem>>, vector<1x16x4xf32>
      tpu.vector_store %arg7[%c0_52, %c0_53, %c0_54], %109 {strides = array<i32>} : memref<1x16x4xf32, #tpu.memory_space<vmem>>, vector<1x16x4xf32>,
      %cst_55 = arith.constant 0.000000e+00 : f32
      %111 = vector.broadcast %cst_55 : f32 to vector<1x16x4xf32>
      %c0_56 = arith.constant 0 : index
      %c0_57 = arith.constant 0 : index
      %c0_58 = arith.constant 0 : index
      %112 = vector.load %arg8[%c0_56, %c0_57, %c0_58] : memref<1x16x4xf32, #tpu.memory_space<vmem>>, vector<1x16x4xf32>
      tpu.vector_store %arg8[%c0_56, %c0_57, %c0_58], %111 {strides = array<i32>} : memref<1x16x4xf32, #tpu.memory_space<vmem>>, vector<1x16x4xf32>,
      %cst_59 = arith.constant 0.000000e+00 : f32
      %113 = vector.broadcast %cst_59 : f32 to vector<1x16x32xf32>
      %c0_60 = arith.constant 0 : index
      %c0_61 = arith.constant 0 : index
      %c0_62 = arith.constant 0 : index
      %114 = vector.load %arg9[%c0_60, %c0_61, %c0_62] : memref<1x16x32xf32, #tpu.memory_space<vmem>>, vector<1x16x32xf32>
      tpu.vector_store %arg9[%c0_60, %c0_61, %c0_62], %113 {strides = array<i32>} : memref<1x16x32xf32, #tpu.memory_space<vmem>>, vector<1x16x32xf32>,
    } else {
    }
    %c0 = arith.constant 0 : index
    %c0_1 = arith.constant 0 : index
    %c0_2 = arith.constant 0 : index
    %3 = vector.load %arg6[%c0, %c0_1, %c0_2] : memref<1x16x32xf32, #tpu.memory_space<vmem>>, vector<1x16x32xf32>
    %c0_3 = arith.constant 0 : index
    %c0_4 = arith.constant 0 : index
    %c0_5 = arith.constant 0 : index
    %4 = vector.load %arg3[%c0_3, %c0_4, %c0_5] : memref<1x16x32xf32, #tpu.memory_space<vmem>>, vector<1x16x32xf32>
    %c0_6 = arith.constant 0 : index
    %c0_7 = arith.constant 0 : index
    %c0_8 = arith.constant 0 : index
    %5 = vector.load %arg4[%c0_6, %c0_7, %c0_8] : memref<1x16x32xf32, #tpu.memory_space<vmem>>, vector<1x16x32xf32>
    %c0_9 = arith.constant 0 : index
    %c0_10 = arith.constant 0 : index
    %c0_11 = arith.constant 0 : index
    %6 = vector.load %arg7[%c0_9, %c0_10, %c0_11] : memref<1x16x4xf32, #tpu.memory_space<vmem>>, vector<1x16x4xf32>
    %c0_12 = arith.constant 0 : index
    %c0_13 = arith.constant 0 : index
    %c0_14 = arith.constant 0 : index
    %7 = vector.load %arg8[%c0_12, %c0_13, %c0_14] : memref<1x16x4xf32, #tpu.memory_space<vmem>>, vector<1x16x4xf32>
    %8 = vector.extract_strided_slice %3 {offsets = [0, 0, 0], sizes = [1, 16, 8], strides = [1, 1, 1]} : vector<1x16x32xf32> to vector<1x16x8xf32>
    %9 = vector.extract_strided_slice %4 {offsets = [0, 0, 0], sizes = [1, 16, 8], strides = [1, 1, 1]} : vector<1x16x32xf32> to vector<1x16x8xf32>
    %10 = vector.extract_strided_slice %5 {offsets = [0, 0, 0], sizes = [1, 16, 8], strides = [1, 1, 1]} : vector<1x16x32xf32> to vector<1x16x8xf32>
    "tpu.trace_start"() <{level = 10 : i32, message = "gid,gjd->gij"}> : () -> ()
    %cst = arith.constant dense<0.000000e+00> : vector<1x16x16xf32>
    %11 = tpu.matmul %8, %9, %cst {dimension_numbers = #tpu.dot_dimension_numbers<[2], [2], [1], [1], [0, 0, 0, 1, 1, 1], [0], [0]>} : vector<1x16x8xf32>, vector<1x16x8xf32>, vector<1x16x16xf32> -> vector<1x16x16xf32>
    "tpu.trace_stop"() : () -> ()
    %12 = vector.extract_strided_slice %6 {offsets = [0, 0, 0], sizes = [1, 16, 1], strides = [1, 1, 1]} : vector<1x16x4xf32> to vector<1x16x1xf32>
    %13 = vector.extract_strided_slice %7 {offsets = [0, 0, 0], sizes = [1, 16, 1], strides = [1, 1, 1]} : vector<1x16x4xf32> to vector<1x16x1xf32>
    %cst_15 = arith.constant dense<0xFF800000> : vector<1x16xf32>
    %14 = vector.multi_reduction <maximumf>, %11, %cst_15 [2] : vector<1x16x16xf32> to vector<1x16xf32>
    %15 = vector.shape_cast %14 : vector<1x16xf32> to vector<1x16x1xf32>
    %16 = arith.maximumf %12, %15 : vector<1x16x1xf32>
    %17 = arith.subf %12, %16 : vector<1x16x1xf32>
    %18 = math.exp %17 : vector<1x16x1xf32>
    %19 = vector.broadcast %16 : vector<1x16x1xf32> to vector<1x16x16xf32>
    %20 = arith.subf %11, %19 : vector<1x16x16xf32>
    %21 = math.exp %20 : vector<1x16x16xf32>
    %22 = arith.mulf %18, %13 : vector<1x16x1xf32>
    %cst_16 = arith.constant dense<0.000000e+00> : vector<1x16xf32>
    %23 = vector.multi_reduction <add>, %21, %cst_16 [2] : vector<1x16x16xf32> to vector<1x16xf32>
    %24 = vector.shape_cast %23 : vector<1x16xf32> to vector<1x16x1xf32>
    %25 = arith.addf %22, %24 : vector<1x16x1xf32>
    "tpu.trace_start"() <{level = 10 : i32, message = "gij,gjd->gid"}> : () -> ()
    %cst_17 = arith.constant dense<0.000000e+00> : vector<1x16x8xf32>
    %26 = tpu.matmul %21, %10, %cst_17 {dimension_numbers = #tpu.dot_dimension_numbers<[2], [1], [1], [2], [0, 0, 0, 1, 1, 2], [0], [0]>} : vector<1x16x16xf32>, vector<1x16x8xf32>, vector<1x16x8xf32> -> vector<1x16x8xf32>
    "tpu.trace_stop"() : () -> ()
    %27 = vector.shape_cast %18 : vector<1x16x1xf32> to vector<1x16x1xf32>
    %28 = vector.broadcast %27 : vector<1x16x1xf32> to vector<1x16x8xf32>
    %29 = vector.extract_strided_slice %3 {offsets = [0, 0, 8], sizes = [1, 16, 8], strides = [1, 1, 1]} : vector<1x16x32xf32> to vector<1x16x8xf32>
    %30 = vector.extract_strided_slice %4 {offsets = [0, 0, 8], sizes = [1, 16, 8], strides = [1, 1, 1]} : vector<1x16x32xf32> to vector<1x16x8xf32>
    %31 = vector.extract_strided_slice %5 {offsets = [0, 0, 8], sizes = [1, 16, 8], strides = [1, 1, 1]} : vector<1x16x32xf32> to vector<1x16x8xf32>
    "tpu.trace_start"() <{level = 10 : i32, message = "gid,gjd->gij"}> : () -> ()
    %cst_18 = arith.constant dense<0.000000e+00> : vector<1x16x16xf32>
    %32 = tpu.matmul %29, %30, %cst_18 {dimension_numbers = #tpu.dot_dimension_numbers<[2], [2], [1], [1], [0, 0, 0, 1, 1, 1], [0], [0]>} : vector<1x16x8xf32>, vector<1x16x8xf32>, vector<1x16x16xf32> -> vector<1x16x16xf32>
    "tpu.trace_stop"() : () -> ()
    %33 = vector.extract_strided_slice %6 {offsets = [0, 0, 1], sizes = [1, 16, 1], strides = [1, 1, 1]} : vector<1x16x4xf32> to vector<1x16x1xf32>
    %34 = vector.extract_strided_slice %7 {offsets = [0, 0, 1], sizes = [1, 16, 1], strides = [1, 1, 1]} : vector<1x16x4xf32> to vector<1x16x1xf32>
    %cst_19 = arith.constant dense<0xFF800000> : vector<1x16xf32>
    %35 = vector.multi_reduction <maximumf>, %32, %cst_19 [2] : vector<1x16x16xf32> to vector<1x16xf32>
    %36 = vector.shape_cast %35 : vector<1x16xf32> to vector<1x16x1xf32>
    %37 = arith.maximumf %33, %36 : vector<1x16x1xf32>
    %38 = arith.subf %33, %37 : vector<1x16x1xf32>
    %39 = math.exp %38 : vector<1x16x1xf32>
    %40 = vector.broadcast %37 : vector<1x16x1xf32> to vector<1x16x16xf32>
    %41 = arith.subf %32, %40 : vector<1x16x16xf32>
    %42 = math.exp %41 : vector<1x16x16xf32>
    %43 = arith.mulf %39, %34 : vector<1x16x1xf32>
    %cst_20 = arith.constant dense<0.000000e+00> : vector<1x16xf32>
    %44 = vector.multi_reduction <add>, %42, %cst_20 [2] : vector<1x16x16xf32> to vector<1x16xf32>
    %45 = vector.shape_cast %44 : vector<1x16xf32> to vector<1x16x1xf32>
    %46 = arith.addf %43, %45 : vector<1x16x1xf32>
    "tpu.trace_start"() <{level = 10 : i32, message = "gij,gjd->gid"}> : () -> ()
    %cst_21 = arith.constant dense<0.000000e+00> : vector<1x16x8xf32>
    %47 = tpu.matmul %42, %31, %cst_21 {dimension_numbers = #tpu.dot_dimension_numbers<[2], [1], [1], [2], [0, 0, 0, 1, 1, 2], [0], [0]>} : vector<1x16x16xf32>, vector<1x16x8xf32>, vector<1x16x8xf32> -> vector<1x16x8xf32>
    "tpu.trace_stop"() : () -> ()
    %48 = vector.shape_cast %39 : vector<1x16x1xf32> to vector<1x16x1xf32>
    %49 = vector.broadcast %48 : vector<1x16x1xf32> to vector<1x16x8xf32>
    %50 = vector.extract_strided_slice %3 {offsets = [0, 0, 16], sizes = [1, 16, 8], strides = [1, 1, 1]} : vector<1x16x32xf32> to vector<1x16x8xf32>
    %51 = vector.extract_strided_slice %4 {offsets = [0, 0, 16], sizes = [1, 16, 8], strides = [1, 1, 1]} : vector<1x16x32xf32> to vector<1x16x8xf32>
    %52 = vector.extract_strided_slice %5 {offsets = [0, 0, 16], sizes = [1, 16, 8], strides = [1, 1, 1]} : vector<1x16x32xf32> to vector<1x16x8xf32>
    "tpu.trace_start"() <{level = 10 : i32, message = "gid,gjd->gij"}> : () -> ()
    %cst_22 = arith.constant dense<0.000000e+00> : vector<1x16x16xf32>
    %53 = tpu.matmul %50, %51, %cst_22 {dimension_numbers = #tpu.dot_dimension_numbers<[2], [2], [1], [1], [0, 0, 0, 1, 1, 1], [0], [0]>} : vector<1x16x8xf32>, vector<1x16x8xf32>, vector<1x16x16xf32> -> vector<1x16x16xf32>
    "tpu.trace_stop"() : () -> ()
    %54 = vector.extract_strided_slice %6 {offsets = [0, 0, 2], sizes = [1, 16, 1], strides = [1, 1, 1]} : vector<1x16x4xf32> to vector<1x16x1xf32>
    %55 = vector.extract_strided_slice %7 {offsets = [0, 0, 2], sizes = [1, 16, 1], strides = [1, 1, 1]} : vector<1x16x4xf32> to vector<1x16x1xf32>
    %cst_23 = arith.constant dense<0xFF800000> : vector<1x16xf32>
    %56 = vector.multi_reduction <maximumf>, %53, %cst_23 [2] : vector<1x16x16xf32> to vector<1x16xf32>
    %57 = vector.shape_cast %56 : vector<1x16xf32> to vector<1x16x1xf32>
    %58 = arith.maximumf %54, %57 : vector<1x16x1xf32>
    %59 = arith.subf %54, %58 : vector<1x16x1xf32>
    %60 = math.exp %59 : vector<1x16x1xf32>
    %61 = vector.broadcast %58 : vector<1x16x1xf32> to vector<1x16x16xf32>
    %62 = arith.subf %53, %61 : vector<1x16x16xf32>
    %63 = math.exp %62 : vector<1x16x16xf32>
    %64 = arith.mulf %60, %55 : vector<1x16x1xf32>
    %cst_24 = arith.constant dense<0.000000e+00> : vector<1x16xf32>
    %65 = vector.multi_reduction <add>, %63, %cst_24 [2] : vector<1x16x16xf32> to vector<1x16xf32>
    %66 = vector.shape_cast %65 : vector<1x16xf32> to vector<1x16x1xf32>
    %67 = arith.addf %64, %66 : vector<1x16x1xf32>
    "tpu.trace_start"() <{level = 10 : i32, message = "gij,gjd->gid"}> : () -> ()
    %cst_25 = arith.constant dense<0.000000e+00> : vector<1x16x8xf32>
    %68 = tpu.matmul %63, %52, %cst_25 {dimension_numbers = #tpu.dot_dimension_numbers<[2], [1], [1], [2], [0, 0, 0, 1, 1, 2], [0], [0]>} : vector<1x16x16xf32>, vector<1x16x8xf32>, vector<1x16x8xf32> -> vector<1x16x8xf32>
    "tpu.trace_stop"() : () -> ()
    %69 = vector.shape_cast %60 : vector<1x16x1xf32> to vector<1x16x1xf32>
    %70 = vector.broadcast %69 : vector<1x16x1xf32> to vector<1x16x8xf32>
    %71 = vector.extract_strided_slice %3 {offsets = [0, 0, 24], sizes = [1, 16, 8], strides = [1, 1, 1]} : vector<1x16x32xf32> to vector<1x16x8xf32>
    %72 = vector.extract_strided_slice %4 {offsets = [0, 0, 24], sizes = [1, 16, 8], strides = [1, 1, 1]} : vector<1x16x32xf32> to vector<1x16x8xf32>
    %73 = vector.extract_strided_slice %5 {offsets = [0, 0, 24], sizes = [1, 16, 8], strides = [1, 1, 1]} : vector<1x16x32xf32> to vector<1x16x8xf32>
    "tpu.trace_start"() <{level = 10 : i32, message = "gid,gjd->gij"}> : () -> ()
    %cst_26 = arith.constant dense<0.000000e+00> : vector<1x16x16xf32>
    %74 = tpu.matmul %71, %72, %cst_26 {dimension_numbers = #tpu.dot_dimension_numbers<[2], [2], [1], [1], [0, 0, 0, 1, 1, 1], [0], [0]>} : vector<1x16x8xf32>, vector<1x16x8xf32>, vector<1x16x16xf32> -> vector<1x16x16xf32>
    "tpu.trace_stop"() : () -> ()
    %75 = vector.extract_strided_slice %6 {offsets = [0, 0, 3], sizes = [1, 16, 1], strides = [1, 1, 1]} : vector<1x16x4xf32> to vector<1x16x1xf32>
    %76 = vector.extract_strided_slice %7 {offsets = [0, 0, 3], sizes = [1, 16, 1], strides = [1, 1, 1]} : vector<1x16x4xf32> to vector<1x16x1xf32>
    %cst_27 = arith.constant dense<0xFF800000> : vector<1x16xf32>
    %77 = vector.multi_reduction <maximumf>, %74, %cst_27 [2] : vector<1x16x16xf32> to vector<1x16xf32>
    %78 = vector.shape_cast %77 : vector<1x16xf32> to vector<1x16x1xf32>
    %79 = arith.maximumf %75, %78 : vector<1x16x1xf32>
    %80 = arith.subf %75, %79 : vector<1x16x1xf32>
    %81 = math.exp %80 : vector<1x16x1xf32>
    %82 = vector.broadcast %79 : vector<1x16x1xf32> to vector<1x16x16xf32>
    %83 = arith.subf %74, %82 : vector<1x16x16xf32>
    %84 = math.exp %83 : vector<1x16x16xf32>
    %85 = arith.mulf %81, %76 : vector<1x16x1xf32>
    %cst_28 = arith.constant dense<0.000000e+00> : vector<1x16xf32>
    %86 = vector.multi_reduction <add>, %84, %cst_28 [2] : vector<1x16x16xf32> to vector<1x16xf32>
    %87 = vector.shape_cast %86 : vector<1x16xf32> to vector<1x16x1xf32>
    %88 = arith.addf %85, %87 : vector<1x16x1xf32>
    "tpu.trace_start"() <{level = 10 : i32, message = "gij,gjd->gid"}> : () -> ()
    %cst_29 = arith.constant dense<0.000000e+00> : vector<1x16x8xf32>
    %89 = tpu.matmul %84, %73, %cst_29 {dimension_numbers = #tpu.dot_dimension_numbers<[2], [1], [1], [2], [0, 0, 0, 1, 1, 2], [0], [0]>} : vector<1x16x16xf32>, vector<1x16x8xf32>, vector<1x16x8xf32> -> vector<1x16x8xf32>
    "tpu.trace_stop"() : () -> ()
    %90 = vector.shape_cast %81 : vector<1x16x1xf32> to vector<1x16x1xf32>
    %91 = vector.broadcast %90 : vector<1x16x1xf32> to vector<1x16x8xf32>
    %92 = tpu.concatenate %16, %37, %58, %79 in 2 : vector<1x16x1xf32>, vector<1x16x1xf32>, vector<1x16x1xf32>, vector<1x16x1xf32> -> vector<1x16x4xf32>
    %c0_30 = arith.constant 0 : index
    %c0_31 = arith.constant 0 : index
    %c0_32 = arith.constant 0 : index
    %93 = vector.load %arg7[%c0_30, %c0_31, %c0_32] : memref<1x16x4xf32, #tpu.memory_space<vmem>>, vector<1x16x4xf32>
    tpu.vector_store %arg7[%c0_30, %c0_31, %c0_32], %92 {strides = array<i32>} : memref<1x16x4xf32, #tpu.memory_space<vmem>>, vector<1x16x4xf32>,
    %94 = tpu.concatenate %25, %46, %67, %88 in 2 : vector<1x16x1xf32>, vector<1x16x1xf32>, vector<1x16x1xf32>, vector<1x16x1xf32> -> vector<1x16x4xf32>
    %c0_33 = arith.constant 0 : index
    %c0_34 = arith.constant 0 : index
    %c0_35 = arith.constant 0 : index
    %95 = vector.load %arg8[%c0_33, %c0_34, %c0_35] : memref<1x16x4xf32, #tpu.memory_space<vmem>>, vector<1x16x4xf32>
    tpu.vector_store %arg8[%c0_33, %c0_34, %c0_35], %94 {strides = array<i32>} : memref<1x16x4xf32, #tpu.memory_space<vmem>>, vector<1x16x4xf32>,
    %96 = tpu.concatenate %28, %49, %70, %91 in 2 : vector<1x16x8xf32>, vector<1x16x8xf32>, vector<1x16x8xf32>, vector<1x16x8xf32> -> vector<1x16x32xf32>
    %c0_36 = arith.constant 0 : index
    %c0_37 = arith.constant 0 : index
    %c0_38 = arith.constant 0 : index
    %97 = vector.load %arg9[%c0_36, %c0_37, %c0_38] : memref<1x16x32xf32, #tpu.memory_space<vmem>>, vector<1x16x32xf32>
    %98 = arith.mulf %96, %97 : vector<1x16x32xf32>
    %99 = tpu.concatenate %26, %47, %68, %89 in 2 : vector<1x16x8xf32>, vector<1x16x8xf32>, vector<1x16x8xf32>, vector<1x16x8xf32> -> vector<1x16x32xf32>
    %100 = arith.addf %98, %99 : vector<1x16x32xf32>
    %c0_39 = arith.constant 0 : index
    %c0_40 = arith.constant 0 : index
    %c0_41 = arith.constant 0 : index
    %101 = vector.load %arg9[%c0_39, %c0_40, %c0_41] : memref<1x16x32xf32, #tpu.memory_space<vmem>>, vector<1x16x32xf32>
    tpu.vector_store %arg9[%c0_39, %c0_40, %c0_41], %100 {strides = array<i32>} : memref<1x16x32xf32, #tpu.memory_space<vmem>>, vector<1x16x32xf32>,
    %c0_i32_42 = arith.constant 0 : i32
    %102 = arith.cmpi eq, %arg1, %c0_i32_42 : i32
    %103 = arith.extui %102 : i1 to i32
    %c0_i32_43 = arith.constant 0 : i32
    %104 = arith.cmpi ne, %103, %c0_i32_43 : i32
    scf.if %104 {
      %c0_44 = arith.constant 0 : index
      %c0_45 = arith.constant 0 : index
      %c0_46 = arith.constant 0 : index
      %105 = vector.load %arg8[%c0_44, %c0_45, %c0_46] : memref<1x16x4xf32, #tpu.memory_space<vmem>>, vector<1x16x4xf32>
      %106 = vector.extract_strided_slice %105 {offsets = [0, 0, 0], sizes = [1, 16, 1], strides = [1, 1, 1]} : vector<1x16x4xf32> to vector<1x16x1xf32>
      %107 = tpu.reciprocal %106 {approx = true} : vector<1x16x1xf32> -> vector<1x16x1xf32>
      %108 = vector.shape_cast %107 : vector<1x16x1xf32> to vector<1x16x1xf32>
      %109 = vector.broadcast %108 : vector<1x16x1xf32> to vector<1x16x8xf32>
      %110 = vector.extract_strided_slice %105 {offsets = [0, 0, 1], sizes = [1, 16, 1], strides = [1, 1, 1]} : vector<1x16x4xf32> to vector<1x16x1xf32>
      %111 = tpu.reciprocal %110 {approx = true} : vector<1x16x1xf32> -> vector<1x16x1xf32>
      %112 = vector.shape_cast %111 : vector<1x16x1xf32> to vector<1x16x1xf32>
      %113 = vector.broadcast %112 : vector<1x16x1xf32> to vector<1x16x8xf32>
      %114 = vector.extract_strided_slice %105 {offsets = [0, 0, 2], sizes = [1, 16, 1], strides = [1, 1, 1]} : vector<1x16x4xf32> to vector<1x16x1xf32>
      %115 = tpu.reciprocal %114 {approx = true} : vector<1x16x1xf32> -> vector<1x16x1xf32>
      %116 = vector.shape_cast %115 : vector<1x16x1xf32> to vector<1x16x1xf32>
      %117 = vector.broadcast %116 : vector<1x16x1xf32> to vector<1x16x8xf32>
      %118 = vector.extract_strided_slice %105 {offsets = [0, 0, 3], sizes = [1, 16, 1], strides = [1, 1, 1]} : vector<1x16x4xf32> to vector<1x16x1xf32>
      %119 = tpu.reciprocal %118 {approx = true} : vector<1x16x1xf32> -> vector<1x16x1xf32>
      %120 = vector.shape_cast %119 : vector<1x16x1xf32> to vector<1x16x1xf32>
      %121 = vector.broadcast %120 : vector<1x16x1xf32> to vector<1x16x8xf32>
      %c0_47 = arith.constant 0 : index
      %c0_48 = arith.constant 0 : index
      %c0_49 = arith.constant 0 : index
      %122 = vector.load %arg9[%c0_47, %c0_48, %c0_49] : memref<1x16x32xf32, #tpu.memory_space<vmem>>, vector<1x16x32xf32>
      %123 = tpu.concatenate %109, %113, %117, %121 in 2 : vector<1x16x8xf32>, vector<1x16x8xf32>, vector<1x16x8xf32>, vector<1x16x8xf32> -> vector<1x16x32xf32>
      %124 = arith.mulf %122, %123 : vector<1x16x32xf32>
      %c0_50 = arith.constant 0 : index
      %c0_51 = arith.constant 0 : index
      %c0_52 = arith.constant 0 : index
      %125 = vector.load %arg5[%c0_50, %c0_51, %c0_52] : memref<1x16x32xf32, #tpu.memory_space<vmem>>, vector<1x16x32xf32>
      tpu.vector_store %arg5[%c0_50, %c0_51, %c0_52], %124 {strides = array<i32>} : memref<1x16x32xf32, #tpu.memory_space<vmem>>, vector<1x16x32xf32>,
    } else {
    }
    return
  }
  func.func @transform_0(%arg0: i32, %arg1: i32) -> (i32, i32, i32) {
    %c0_i32 = arith.constant 0 : i32
    %c0_i32_0 = arith.constant 0 : i32
    %c0_i32_1 = arith.constant 0 : i32
    return %arg0, %c0_i32, %c0_i32_0 : i32, i32, i32
  }
  func.func @transform_1(%arg0: i32, %arg1: i32) -> (i32, i32, i32) {
    %c0_i32 = arith.constant 0 : i32
    %c0_i32_0 = arith.constant 0 : i32
    return %arg0, %arg1, %c0_i32 : i32, i32, i32
  }
  func.func @transform_2(%arg0: i32, %arg1: i32) -> (i32, i32, i32) {
    %c0_i32 = arith.constant 0 : i32
    %c0_i32_0 = arith.constant 0 : i32
    return %arg0, %arg1, %c0_i32 : i32, i32, i32
  }
  func.func @transform_3(%arg0: i32, %arg1: i32) -> (i32, i32, i32) {
    %c0_i32 = arith.constant 0 : i32
    %c0_i32_0 = arith.constant 0 : i32
    %c0_i32_1 = arith.constant 0 : i32
    return %arg0, %c0_i32, %c0_i32_0 : i32, i32, i32
  }
}

</mosaic_0001>

<bundles_post_ra>
// kernel: tpu_custom_call.1
= control target key start
LH: loop header
LB: loop body
LE: loop exit
PB: predicated region body
PF: predicated region fallthrough
CT: control target
= control target key end

     0   :  { %s1911_s0 = inlined_call_operand.hbm [shape: f32[2,16,32], index: 0, kind: input, shape index: {}]   ;;  %s1912_s1 = inlined_call_operand.hbm [shape: f32[2,16,32], index: 1, kind: input, shape index: {}]   ;;  %s1913_s2 = inlined_call_operand.hbm [shape: f32[2,16,32], index: 2, kind: input, shape index: {}]   ;;  %s1914_s3 = inlined_call_operand.hbm [shape: f32[2,16,32], index: 3, kind: output, shape index: {}]  }
   0x1   :  { %1920 = sst [smem:[#allocation21_spill]] %s1912_s1 }
   0x2   :  { %8 = vsyncpa [#allocation7], 0 }
   0x3   :  { %10 = vsyncpa [#allocation7 + $0x1], 0 }
   0x4   :  { %11 = vsyncpa [#allocation10], 0 }
   0x5   :  { %13 = vsyncpa [#allocation10 + $0x1], 0 }
   0x6   :  { %14 = vsyncpa [#allocation8], 0 }
   0x7   :  { %16 = vsyncpa [#allocation8 + $0x1], 0  ;;  %s1496_s12 = smov 0   ;;  %s1498_s13 = smov 0  }
   0x8   :  { %s1500_s14 = smov 0   ;;  %s1502_s15 = smov 0  }
   0x9   :  { %s1504_s16 = smov 0   ;;  %s1506_s17 = smov 0  }
   0xa LB: > { %1921 = sst [smem:[#allocation16_spill]] %s1447_s14  ;;  %s1527_s18 = sadd.s32 4294967295, %s1459_s17   ;;  %s1459_s17 = sphi %s1506_s17, %s22_s17   ;;  %s1455_s16 = sphi %s1504_s16, %s1937_s16   ;;  %s1451_s15 = sphi %s1502_s15, %s1936_s15   ;;  %s1447_s14 = sphi %s1500_s14, %s1935_s14   ;;  %s1443_s13 = sphi %s1498_s13, %s1939_s13   ;;  %s1439_s12 = sphi %s1496_s12, %s1938_s12  }
   0xb   : > { %1922 = sst [smem:[#allocation17_spill]] %s1455_s16  ;;  %s1078_s19 = sadd.s32 4294967294, %s1459_s17  }
   0xc   : > { %1923 = sst [smem:[#allocation18_spill]] %s1459_s17  ;;  %s34_s20 = sadd.s32 1, %s1455_s16 }
   0xd   : > { %s41_s21 = sadd.s32 1, %s1447_s14  ;;  %p36_p0 = scmp.ge.s32.totalorder %s34_s20, 2 }
   0xe   : > { %p48_p1 = scmp.ne.s32.totalorder %s1447_s14, %s1443_s13  ;;  %p49_p2 = scmp.eq.s32.totalorder %s1459_s17, 0 }
   0xf   : > { %p54_p3 = scmp.ne.s32.totalorder %s1443_s13, %s1439_s12  ;;  %s1941_s20 = smov (%p36_p0, %s34_s20), 0 }
  0x10   : > { %1924 = sst [smem:[#allocation19_spill]] %s1941_s20  ;;  %p1539_p4 = por %p49_p2, %p48_p1 }
  0x11   : > { %p55_p5 = scmp.eq.s32.totalorder %s1527_s18, 0  ;;  %s38_s23 = ssub.s32 %s1455_s16, %s1941_s20 }
  0x12   : > { %p134_p6 = scmp.eq.s32.totalorder %s1527_s18, 1  ;;  %p39_p7 = scmp.eq.s32.totalorder %s38_s23, 0 }
  0x13   : > { %p1547_p8 = por %p55_p5, %p54_p3  ;;  %p140_p10 = scmp.eq.s32.totalorder %s1078_s19, 1 }
  0x14   : > { %p1551_p9 = por %p134_p6, %p48_p1  ;;  %p1080_p12 = scmp.ge.s32.totalorder %s1459_s17, 2 }
  0x15   : > { %s1556_s26 = scalar_select %p39_p7, %s1447_s14, %s41_s21  }
  0x16   : > { %p1558_p11 = por %p140_p10, %p54_p3  ;;  %p1150_p13 = scmp.lt.s32.totalorder %s1459_s17, 2 }
  0x17   : > { %1928 = sst [smem:[#allocation20_spill]] %s1556_s26  ;;  %s160_s28 = sand.u32 1, %s1447_s14  }
  0x18   : > { %s1565_s29 = sshll.u32 %s160_s28, 4  ;;  %s1124_s30 = sshll.u32 %s1455_s16, 4 }
  0x19   : > { %p1570_p0 = pnand %p1150_p13, %p1539_p4  ;;  %s182_s5 = sand.u32 1, %s1459_s17  }
  0x1a   : > { %s1931_s1 = sld [smem:[#allocation21_spill]]  ;;  %s186_s10 = scalar_lea.vmem [#allocation9], %s1565_s29 }
  0x1b   : > { %s196_s11 = sshll.u32 %s186_s10, 4  ;;  %s183_s19 = scalar_lea.sflag [#allocation10], %s182_s5  ;;  %s197_s11 = int_to_ptr.vmem [resolvable:$true] %s196_s11 }
  0x1c   : > { %s1461_s21 = smov 128   ;;  %s1462_s22 = smov 8  }
  0x1d   : > { %p1090_p1 = scmp.ge.s32.totalorder %s1459_s17, 1  ;;  %p228_p2 = scmp.lt.s32.totalorder %s1459_s17, 3 }
  0x1e   : > { %s161_s5 = scalar_lea.sflag [#allocation7], %s160_s28  ;;  %s217_s16 = scalar_lea.hbm %s1913_s2, %s1124_s30 }
  0x1f   : > { %p1583_p3 = pnand %p1090_p1, %p228_p2  ;;  %s218_s26 = sshll.u32 %s217_s16, 4  ;;  %s219_s26 = int_to_ptr.hbm [resolvable:$true] %s218_s26 }
  0x20   : > { %s193_s8 = scalar_lea.hbm %s1931_s1, %s1124_s30  ;;  %s164_s1 = scalar_lea.vmem [#allocation6], %s1565_s29 }
  0x21   : > { %s194_s9 = sshll.u32 %s193_s8, 4  ;;  %s169_s8 = scalar_lea.hbm %s1911_s0, %s1124_s30  ;;  %s195_s9 = int_to_ptr.hbm [resolvable:$true] %s194_s9 }
  0x22   : > { %1142 = dma.hbm_to_vmem [thread:$0]  (!%p1570_p0), %s195_s9, 256, %s197_s11, %s183_s19, %s1461_s21, %s1461_s21, %s1462_s22  }
  0x23   : > { %s170_s10 = sshll.u32 %s169_s8, 4  ;;  %s172_s20 = sshll.u32 %s164_s1, 4  ;;  %s171_s10 = int_to_ptr.hbm [resolvable:$true] %s170_s10  ;;  %s173_s20 = int_to_ptr.vmem [resolvable:$true] %s172_s20 }
  0x24   : > { %1139 = dma.hbm_to_vmem [thread:$0]  (!%p1570_p0), %s171_s10, 256, %s173_s20, %s161_s5, %s1461_s21, %s1461_s21, %s1462_s22  }
  0x25   : > { %s210_s14 = scalar_lea.vmem [#allocation11], %s1565_s29  ;;  %232 = sbr.rel (%p1583_p3) target bundleno = 1252 (0x4e4), region = 32 }
  0x26   : > { %s220_s17 = sshll.u32 %s210_s14, 4  ;;  %s1602_s1 = sand.u32 (!%p1583_p3), 1, %s1443_s13   ;;  %s221_s17 = int_to_ptr.vmem [resolvable:$true] %s220_s17 }
  0x27   : > { %1145 = dma.hbm_to_vmem [thread:$0]  (!%p1570_p0), %s219_s26, 256, %s221_s17, %s183_s19, %s1461_s21, %s1461_s21, %s1462_s22  }
  0x28   : > { %s1605_s20 = sshll.u32 (!%p1583_p3), %s1602_s1, 4  ;;  %s235_s28 = scalar_lea.sflag (!%p1583_p3), [#allocation7], %s1602_s1 }
  0x29   : > { %s238_s16 = scalar_lea.vmem (!%p1583_p3), [#allocation6], %s1605_s20 }
  0x2a   : > { %1426 = dma.done.wait (%p1547_p8), %s235_s28, 256  }
  0x2b   : > { %1428 = vsyncadd (%p1547_p8), %s235_s28, 4294967040  ;;  %s244_s14 = sand.u32 1, %s1527_s18   ;;  %s248_s26 = scalar_lea.vmem [#allocation9], %s1605_s20 }
  0x2c   : > { %s245_s17 = scalar_lea.sflag [#allocation10], %s244_s14 }
  0x2d   : > { %1430 = dma.done.wait (%p1547_p8), %s245_s17, 512  }
  0x2e   : > { %1432 = vsyncadd (%p1547_p8), %s245_s17, 4294966784  ;;  %vm322_vm0 = vcmask 64512   ;;  %v315_v0 = vld [vmem:[%s248_s26 + $0x8] sm:$0xff]  ;;  %v298_v1 = vld [vmem:[%s238_s16] sm:$0xff]  ;;  %vm302_vm1 = vcmask 261120   ;;  %s1463_s29 = smov 120  }
  0x2f   : > { %1095 = vmatpush.xpose.msk.msra.mxu0 %vm322_vm0, %v315_v0  ;;  %v314_v2 = vld [vmem:[%s248_s26] sm:$0xff]  ;;  %v300_v3 = vmul.f32 0.35355338, %v298_v1  ;;  %v299_v4 = vld [vmem:[%s238_s16 + $0x8] sm:$0xff]  ;;  %444 = vrot.lane.b32.xlu1 %v315_v0, %s1463_s29  ;;  %vm305_vm2 = vcmask 31744   ;;  %v1464_v10 = vmov -inf  }
  0x30   : > { %v301_v5 = vmul.f32 0.35355338, %v299_v4  ;;  %442 = vrot.lane.b32.xlu2 %v314_v2, %s1463_s29  ;;  %306 = vst.msk [vmem:[#allocation3] sm:$0xff] %vm305_vm2, %v1464_v10  ;;  %vm358_vm3 = vcmask 130048   ;;  %s1465_s18 = smov 112   ;;  %v1466_v16 = vmov 0  }
  0x31   : > { %303 = vst.msk [vmem:[#allocation2] sm:$0xff] %vm302_vm1, %v300_v3  ;;  %1215 = vset.pattern.permute.xlu1 %v1466_v16  ;;  %1216 = vset.pattern.permute.xlu0 %v1466_v16  ;;  %v1467_v17 = vmov 0.0   ;;  %s1468_s24 = smov 104   ;;  %s258_s30 = scalar_lea.vmem [#allocation11], %s1605_s20  ;;  %v1469_v52 = vmov 1   ;;  %vm812_vm4 = vcmask 7168  }
  0x32   : > { %304 = vst.msk [vmem:[#allocation2 + $0x8] sm:$0xff] %vm302_vm1, %v301_v5  ;;  %v317_v24 = vld [vmem:[%s258_s30 + $0x8] sm:$0xff]  ;;  %v316_v25 = vld [vmem:[%s258_s30] sm:$0xff]  ;;  %1228 = vset.pattern.permute.xlu2 %v1469_v52  ;;  %vm815_vm5 = vcmask 15360   ;;  %vm818_vm6 = vcmask 23552   ;;  %s1472_s4 = smov 8  }
  0x33   : > { %1096 = vmatpush.xpose.msk.msra.mxu0 %vm322_vm0, %v314_v2  ;;  %307 = vst.msk [vmem:[#allocation3 + $0x8] sm:$0xff] %vm305_vm2, %v1464_v10  ;;  %419 = vmatpush.msra.mxu1 %v317_v24  ;;  %v1672_v29 = vpack.i.bf16 %v316_v25, %v317_v24  ;;  %s1473_s19 = smov 24   ;;  %s1474_s21 = smov 16   ;;  %vm836_vm7 = vcmask 195584  }
  0x34   : > { %308 = vst.msk [vmem:[#allocation4] sm:$0xff] %vm305_vm2, %v1467_v17  ;;  %s1127_s22 = sshll.u32 %s1451_s15, 4  ;;  %s291_s8 = scalar_lea.vmem [#allocation12], %s1605_s20 }
  0x35   : > { %309 = vst.msk [vmem:[#allocation4 + $0x8] sm:$0xff] %vm305_vm2, %v1467_v17  ;;  %420 = vmatpush.msra.mxu1 %v316_v25  ;;  %s943_s7 = scalar_lea.hbm %s1914_s3, %s1127_s22  ;;  %s944_s10 = sshll.u32 %s291_s8, 4  ;;  %s945_s10 = int_to_ptr.vmem [resolvable:$true] %s944_s10 }
  0x36   : > { %310 = vst.msk [vmem:[#allocation5] sm:$0xff] %vm302_vm1, %v1467_v17  ;;  %s946_s5 = sshll.u32 %s943_s7, 4  ;;  %s932_s15 = scalar_lea.sflag [#allocation8], %s1602_s1  ;;  %s947_s5 = int_to_ptr.hbm [resolvable:$true] %s946_s5 }
  0x37   : > { %311 = vst.msk [vmem:[#allocation5 + $0x8] sm:$0xff] %vm302_vm1, %v1467_v17  ;;  %v1648_v18 = vld [vmem:[#allocation3] sm:$0xff]  ;;  %v1471_v17 = vmov 2   ;;  %s1387_s9 = sshra.s32 %s947_s5, 4  ;;  %s1393_s16 = scalar_lea.hbm %s1914_s3, 32  ;;  %s1388_s9 = int_to_ptr.hbm [resolvable:$true] %s1387_s9 }
  0x38   : > { %v312_v6 = vld [vmem:[#allocation2] sm:$0xff]  ;;  %s1389_s11 = scalar_lea.hbm %s1388_s9, 16  ;;  %p1394_p7 = scmp.lt.s32.totalorder %s1388_s9, %s1914_s3 }
  0x39   : > { %1097 = vmatmul.msk.f32.vlgmr.msra.gmra.mxu0 %vm322_vm0, %v312_v6  ;;  %438 = vrot.lane.b32.xlu2 %v312_v6, %s1463_s29  ;;  %v313_v7 = vld [vmem:[#allocation2 + $0x8] sm:$0xff]  ;;  %p1390_p4 = scmp.ne.s32.totalorder %s1388_s9, %s1389_s11  ;;  %p1395_p8 = scmp.lt.s32.totalorder %s1393_s16, %s1389_s11 }
  0x3a   : > { %v1654_v21 = vld [vmem:[#allocation3 + $0x8] sm:$0xff] }
  0x3b   : > { %p1391_p5 = pnand %p1390_p4, %p1551_p9  ;;  %p1396_p10 = por %p1395_p8, %p1394_p7 }
  0x3d   : > { %p1392_p6 = pneg %p1391_p5 }
  0x3f   : > { %p1397_p13 = pnand %p1396_p10, %p1392_p6 }
  0x41   : > { %1098 = vmatmul.msk.f32.gmra.mxu0 %vm322_vm0, %v313_v7  ;;  %570 = vrot.lane.b32.xlu2 %v315_v0, %s1465_s18 }
  0x49   : > { %568 = vrot.lane.b32.xlu2 %v314_v2, %s1465_s18 }
  0x51   : > { %564 = vrot.lane.b32.xlu2 %v312_v6, %s1465_s18 }
  0x59   : > { %566 = vrot.lane.b32.xlu2 %v313_v7, %s1465_s18 }
  0x8a   : > { %v443_v8 = vpop.permute.xlu2 %442 }
  0x93   : > { %v439_v11 = vpop.permute.xlu2 %438 }
  0x9b   : > { %v571_v36 = vpop.permute.xlu2 %570 }
  0x9c   : > { %1107 = vmatpush.xpose.msk.msrb.mxu1 %vm322_vm0, %v571_v36 }
  0xa1   : > { %v445_v9 = vpop.permute.xlu1 %444 }
  0xa2   : > { %1101 = vmatpush.xpose.msk.msra.mxu2 %vm322_vm0, %v445_v9 }
  0xa3   : > { %v569_v42 = vpop.permute.xlu2 %568 }
  0xa4   : > { %1108 = vmatpush.xpose.msk.msrb.mxu1 %vm322_vm0, %v569_v42 }
  0xa6   : > { %1102 = vmatpush.xpose.msk.msra.mxu2 %vm322_vm0, %v443_v8 }
  0xa9   : > { %1103 = vmatmul.msk.f32.vlgmr.msra.gmra.mxu2 %vm322_vm0, %v439_v11 }
  0xab   : > { %v565_v50 = vpop.permute.xlu2 %564 }
  0xb3   : > { %v567_v51 = vpop.permute.xlu2 %566 }
  0xb6   : > { %v352_v12 = vpop.f32.mrf.mxu0 }
  0xb7   : > { %v359_v13 = vsel %vm358_vm3, %v352_v12, -inf }
  0xb8   : > { %360 = vmax.xlane.f32.xlu0 %v359_v13 }
  0xbe   : > { %v1634_v14 = vpop.f32.mrf.mxu0 }
  0xbf   : > { %v362_v15 = vsel %vm358_vm3, %v1634_v14, -inf }
  0xc0   : > { %363 = vmax.xlane.f32.xlu0 %v362_v15 }
 0x12b   : > { %v361_v19 = vpop.xlane.xlu0 %360 }
 0x12c   : > { %v1651_v20 = vmax.f32 %v1648_v18, %v361_v19  ;;  %v1666_v26 = vpop.f32.mrf.mxu2 }
 0x12d   : > { %v477_v27 = vsel %vm358_vm3, %v1666_v26, -inf }
 0x12e   : > { %375 = vperm.xlu1 %1215, %v1651_v20   ;;  %v367_v28 = vsub.f32 %v1648_v18, %v1651_v20 }
 0x130   : > { %v369_v30 = vmul.f32 1.442695, %v367_v28 }
 0x132   : > { %1247 = vpow2.f32 %v369_v30 }
 0x133   : > { %v364_v22 = vpop.xlane.xlu0 %363 }
 0x134   : > { %v1657_v23 = vmax.f32 %v1654_v21, %v364_v22 }
 0x136   : > { %440 = vrot.lane.b32.xlu1 %v313_v7, %s1463_s29  ;;  %380 = vperm.xlu0 %1216, %v1657_v23   ;;  %v368_v31 = vsub.f32 %v1654_v21, %v1657_v23 }
 0x138   : > { %v371_v32 = vmul.f32 1.442695, %v368_v31  ;;  %v1678_v33 = vpop.eup %1247 }
 0x13a   : > { %1249 = vpow2.f32 %v371_v32 }
 0x13e   : > { %694 = vrot.lane.b32.xlu1 %v315_v0, %s1468_s24  ;;  %1229 = vset.pattern.permute.xlu0 %v1469_v52 }
 0x140   : > { %v1682_v38 = vpop.eup %1249 }
 0x146   : > { %692 = vrot.lane.b32.xlu1 %v314_v2, %s1468_s24 }
 0x14e   : > { %688 = vrot.lane.b32.xlu1 %v312_v6, %s1468_s24 }
 0x156   : > { %690 = vrot.lane.b32.xlu1 %v313_v7, %s1468_s24  ;;  %v1470_v7 = vmov 3  }
 0x180   : > { %478 = vmax.xlane.f32.xlu1 %v477_v27 }
 0x199   : > { %1218 = vrot.lane.b32.xlu1 %v1672_v29, %s1463_s29 }
 0x1a0   : > { %v376_v34 = vpop.permute.xlu1 %375 }
 0x1a1   : > { %v383_v35 = vsub.f32 %v352_v12, %v376_v34  ;;  %430 = vperm.xlu1 %1215, %v1678_v33  }
 0x1a3   : > { %v385_v37 = vmul.f32 1.442695, %v383_v35 }
 0x1a5   : > { %1251 = vpow2.f32 %v385_v37 }
 0x1a8   : > { %v441_v39 = vpop.permute.xlu1 %440  ;;  %v381_v40 = vpop.permute.xlu0 %380 }
 0x1a9   : > { %v384_v41 = vsub.f32 %v1634_v14, %v381_v40  ;;  %1104 = vmatmul.msk.f32.gmra.mxu2 %vm322_vm0, %v441_v39  ;;  %435 = vperm.xlu1 %1215, %v1682_v38  }
 0x1ab   : > { %v1252_v43 = vpop.eup %1251  ;;  %v387_v44 = vmul.f32 1.442695, %v384_v41 }
 0x1ac   : > { %1099 = vmatmul.msk.f32.vlgmr.msra.gmra.mxu1 %vm358_vm3, %v1252_v43  ;;  %v391_v63 = vsel %vm358_vm3, %v1252_v43, 0.0 }
 0x1ad   : > { %1253 = vpow2.f32 %v387_v44 }
 0x1b0   : > { %v695_v45 = vpop.permute.xlu1 %694 }
 0x1b1   : > { %1113 = vmatpush.xpose.msk.msrb.mxu0 %vm322_vm0, %v695_v45  ;;  %1222 = vset.pattern.permute.xlu1 %v1470_v7 }
 0x1b3   : > { %v1254_v46 = vpop.eup %1253 }
 0x1b4   : > { %1100 = vmatmul.msk.f32.gmra.mxu1 %vm358_vm3, %v1254_v46  ;;  %v394_v19 = vsel %vm358_vm3, %v1254_v46, 0.0 }
 0x1b8   : > { %v693_v47 = vpop.permute.xlu1 %692 }
 0x1b9   : > { %1114 = vmatpush.xpose.msk.msrb.mxu0 %vm322_vm0, %v693_v47 }
 0x1bc   : > { %1109 = vmatmul.msk.f32.vlgmr.msrb.gmra.mxu1 %vm322_vm0, %v565_v50 }
 0x1c0   : > { %v689_v48 = vpop.permute.xlu1 %688 }
 0x1c1   : > { %1115 = vmatmul.msk.f32.vlgmr.msrb.gmra.mxu0 %vm322_vm0, %v689_v48 }
 0x1c4   : > { %1110 = vmatmul.msk.f32.gmra.mxu1 %vm322_vm0, %v567_v51 }
 0x1c8   : > { %v691_v49 = vpop.permute.xlu1 %690 }
 0x1c9   : > { %1116 = vmatmul.msk.f32.gmra.mxu0 %vm322_vm0, %v691_v49 }
 0x1f3   : > { %v479_v57 = vpop.xlane.xlu1 %478 }
 0x1f4   : > { %v483_v58 = vmax.f32 %v1648_v18, %v479_v57 }
 0x1f6   : > { %v485_v22 = vsub.f32 %v1648_v18, %v483_v58  ;;  %v813_v34 = vsel %vm812_vm4, %v1651_v20, %v483_v58 }
 0x1f8   : > { %v487_v24 = vmul.f32 1.442695, %v485_v22 }
 0x20b   : > { %v1219_v4 = vpop.permute.xlu1 %1218 }
 0x20c   : > { %v1220_v5 = vunpack.i.l.bf16 %v1219_v4  ;;  %v1221_v6 = vunpack.i.h.bf16 %v1219_v4 }
 0x20e   : > { %545 = vmatpush.msra.mxu3 %v1220_v5 }
 0x210   : > { %546 = vmatpush.msra.mxu3 %v1221_v6  ;;  %v1791_v6 = vld [vmem:[#allocation4 + $0x8] sm:$0xff] }
 0x229   : > { %v1709_v60 = vpop.f32.mrf.mxu1 }
 0x22c   : > { %v1698_v53 = vpop.f32.mrf.mxu2 }
 0x22d   : > { %v480_v54 = vsel %vm358_vm3, %v1698_v53, -inf }
 0x22e   : > { %481 = vmax.xlane.f32.xlu2 %v480_v54 }
 0x231   : > { %v1713_v62 = vpop.f32.mrf.mxu1 }
 0x239   : > { %v1716_v0 = vpop.f32.mrf.mxu1 }
 0x23a   : > { %v603_v1 = vsel %vm358_vm3, %v1716_v0, -inf }
 0x23e   : > { %v1702_v55 = vpop.f32.mrf.mxu0 }
 0x23f   : > { %v727_v56 = vsel %vm358_vm3, %v1702_v55, -inf }
 0x240   : > { %728 = vmax.xlane.f32.xlu0 %v727_v56 }
 0x241   : > { %v1720_v2 = vpop.f32.mrf.mxu1 }
 0x242   : > { %v606_v3 = vsel %vm358_vm3, %v1720_v2, -inf }
 0x246   : > { %493 = vperm.xlu2 %1228, %v483_v58   ;;  %v1707_v59 = vpop.f32.mrf.mxu0 }
 0x247   : > { %v730_v61 = vsel %vm358_vm3, %v1707_v59, -inf }
 0x248   : > { %731 = vmax.xlane.f32.xlu0 %v730_v61 }
 0x24e   : > { %1230 = vset.pattern.permute.xlu2 %v1471_v17 }
 0x26f   : > { %392 = vadd.xlane.f32.xlu2 %v391_v63 }
 0x277   : > { %604 = vmax.xlane.f32.xlu2 %v603_v1 }
 0x27f   : > { %607 = vmax.xlane.f32.xlu2 %v606_v3 }
 0x2a1   : > { %v482_v8 = vpop.xlane.xlu2 %481 }
 0x2a2   : > { %v484_v9 = vmax.f32 %v1654_v21, %v482_v8  ;;  %v390_v8 = vmul.f32 %v1682_v38, %v1791_v6 }
 0x2a4   : > { %498 = vperm.xlu0 %1229, %v484_v9   ;;  %v814_v42 = vsel %vm812_vm4, %v1657_v23, %v484_v9  ;;  %v1779_v23 = vpop.permute.xlu1 %430 }
 0x2a9   : > { %v494_v10 = vpop.permute.xlu2 %493 }
 0x2aa   : > { %v501_v11 = vsub.f32 %v1666_v26, %v494_v10  ;;  %v486_v26 = vsub.f32 %v1654_v21, %v484_v9 }
 0x2ac   : > { %v503_v12 = vmul.f32 1.442695, %v501_v11  ;;  %v489_v27 = vmul.f32 1.442695, %v486_v26  ;;  %v1782_v50 = vpop.permute.xlu1 %435 }
 0x2ae   : > { %1255 = vpow2.f32 %v503_v12 }
 0x2af   : > { %1257 = vpow2.f32 %v487_v24 }
 0x2b0   : > { %1259 = vpow2.f32 %v489_v27 }
 0x2b3   : > { %v729_v13 = vpop.xlane.xlu0 %728 }
 0x2b4   : > { %v1256_v14 = vpop.eup %1255  ;;  %v1728_v15 = vmax.f32 %v1648_v18, %v729_v13 }
 0x2b5   : > { %1105 = vmatmul.msk.f32.vlgmr.msra.gmra.mxu3 %vm358_vm3, %v1256_v14  ;;  %v509_v28 = vsel %vm358_vm3, %v1256_v14, 0.0  ;;  %v1743_v30 = vpop.eup %1257 }
 0x2b6   : > { %743 = vperm.xlu1 %1222, %v1728_v15   ;;  %v1759_v40 = vpop.eup %1259  ;;  %v735_v5 = vsub.f32 %v1648_v18, %v1728_v15 }
 0x2be   : > { %1224 = vrot.lane.b32.xlu1 %v1672_v29, %s1465_s18 }
 0x2ce   : > { %395 = vadd.xlane.f32.xlu0 %v394_v19 }
 0x2e2   : > { %v1737_v25 = vpop.xlane.xlu2 %392  ;;  %1233 = vrot.lane.b32.xlu0 %v1672_v29, %s1468_s24  ;;  %v732_v29 = vpop.xlane.xlu0 %731 }
 0x2e3   : > { %v734_v37 = vmax.f32 %v1654_v21, %v732_v29 }
 0x2e5   : > { %v736_v39 = vsub.f32 %v1654_v21, %v734_v37 }
 0x2e7   : > { %v739_v43 = vmul.f32 1.442695, %v736_v39 }
 0x2e8   : > { %510 = vadd.xlane.f32.xlu1 %v509_v28 }
 0x2e9   : > { %1261 = vpow2.f32 %v739_v43 }
 0x2ea   : > { %v605_v31 = vpop.xlane.xlu2 %604  ;;  %556 = vperm.xlu0 %1229, %v1743_v30  }
 0x2eb   : > { %v1747_v32 = vmax.f32 %v1648_v18, %v605_v31 }
 0x2ed   : > { %v816_v35 = vsel %vm815_vm5, %v813_v34, %v1747_v32  ;;  %619 = vperm.xlu2 %1230, %v1747_v32   ;;  %v611_v43 = vsub.f32 %v1648_v18, %v1747_v32 }
 0x2ee   : > { %v819_v36 = vsel %vm818_vm6, %v816_v35, %v1728_v15 }
 0x2ef   : > { %822 = vst.msk [vmem:[#allocation3] sm:$0xff] %vm305_vm2, %v819_v36  ;;  %v1774_v46 = vpop.eup %1261 }
 0x2f2   : > { %v608_v41 = vpop.xlane.xlu2 %607  ;;  %561 = vperm.xlu0 %1229, %v1759_v40  }
 0x2f3   : > { %v1763_v20 = vmax.f32 %v1654_v21, %v608_v41 }
 0x2f5   : > { %v817_v44 = vsel %vm815_vm5, %v814_v42, %v1763_v20  ;;  %624 = vperm.xlu2 %1230, %v1763_v20  }
 0x2f6   : > { %v820_v45 = vsel %vm818_vm6, %v817_v44, %v734_v37 }
 0x2f7   : > { %823 = vst.msk [vmem:[#allocation3 + $0x8] sm:$0xff] %vm305_vm2, %v820_v45 }
 0x2fa   : > { %1237 = vset.pattern.permute.xlu0 %v1470_v7 }
 0x2fd   : > { %1231 = vset.pattern.permute.xlu2 %v1470_v7 }
 0x2fe   : > { %748 = vperm.xlu2 %1231, %v734_v37  }
 0x301   : > { %809 = vperm.xlu1 %1222, %v1774_v46  }
 0x306   : > { %1238 = vset.pattern.permute.xlu2 %v1471_v17 }
 0x309   : > { %1239 = vset.pattern.permute.xlu1 %v1471_v17 }
 0x316   : > { %v499_v47 = vpop.permute.xlu0 %498 }
 0x317   : > { %v502_v48 = vsub.f32 %v1698_v53, %v499_v47 }
 0x319   : > { %v505_v49 = vmul.f32 1.442695, %v502_v48  ;;  %v320_v48 = vld [vmem:[#allocation4] sm:$0xff] }
 0x31b   : > { %1263 = vpow2.f32 %v505_v49 }
 0x321   : > { %v1264_v51 = vpop.eup %1263 }
 0x322   : > { %1106 = vmatmul.msk.f32.gmra.mxu3 %vm358_vm3, %v1264_v51  ;;  %v512_v54 = vsel %vm358_vm3, %v1264_v51, 0.0  ;;  %v507_v51 = vmul.f32 %v1743_v30, %v320_v48 }
 0x327   : > { %513 = vadd.xlane.f32.xlu2 %v512_v54  ;;  %v389_v54 = vmul.f32 %v1678_v33, %v320_v48 }
 0x328   : > { %v744_v56 = vpop.permute.xlu1 %743 }
 0x329   : > { %v751_v57 = vsub.f32 %v1702_v55, %v744_v56  ;;  %v737_v55 = vmul.f32 1.442695, %v735_v5  ;;  %v397_v32 = vadd.f32 %v1737_v25, %v389_v54 }
 0x32b   : > { %v753_v58 = vmul.f32 1.442695, %v751_v57 }
 0x32d   : > { %1265 = vpow2.f32 %v753_v58 }
 0x32e   : > { %1267 = vpow2.f32 %v737_v55 }
 0x330   : > { %v1225_v61 = vpop.permute.xlu1 %1224 }
 0x331   : > { %v1226_v63 = vunpack.i.l.bf16 %v1225_v61  ;;  %v1227_v1 = vunpack.i.h.bf16 %v1225_v61 }
 0x333   : > { %v1266_v3 = vpop.eup %1265  ;;  %669 = vmatpush.msrb.mxu3 %v1226_v63 }
 0x334   : > { %v759_v53 = vsel %vm358_vm3, %v1266_v3, 0.0  ;;  %v1268_v12 = vpop.eup %1267 }
 0x335   : > { %760 = vadd.xlane.f32.xlu0 %v759_v53  ;;  %670 = vmatpush.msrb.mxu3 %v1227_v1  ;;  %v757_v57 = vmul.f32 %v1268_v12, %v320_v48 }
 0x338   : > { %v548_v4 = vpop.f32.mrf.mxu3 }
 0x339   : > { %845 = vrot.lane.b32.xlu1 %v548_v4, %s1472_s4 }
 0x341   : > { %v396_v9 = vpop.xlane.xlu0 %395 }
 0x342   : > { %v1795_v10 = vadd.f32 %v396_v9, %v390_v8 }
 0x347   : > { %v620_v11 = vpop.permute.xlu2 %619 }
 0x348   : > { %v627_v13 = vsub.f32 %v1716_v0, %v620_v11 }
 0x349   : > { %804 = vperm.xlu0 %1237, %v1268_v12  }
 0x34a   : > { %v629_v14 = vmul.f32 1.442695, %v627_v13  ;;  %v508_v13 = vmul.f32 %v1759_v40, %v1791_v6 }
 0x34c   : > { %1269 = vpow2.f32 %v629_v14 }
 0x34f   : > { %v625_v19 = vpop.permute.xlu2 %624 }
 0x350   : > { %v628_v15 = vsub.f32 %v1720_v2, %v625_v19 }
 0x351   : > { %1242 = vset.pattern.permute.xlu0 %v1466_v16 }
 0x352   : > { %v1270_v22 = vpop.eup %1269  ;;  %v631_v24 = vmul.f32 1.442695, %v628_v15 }
 0x353   : > { %1111 = vmatmul.msk.f32.vlgmr.msrb.gmra.mxu3 %vm358_vm3, %v1270_v22  ;;  %v635_v35 = vsel %vm358_vm3, %v1270_v22, 0.0 }
 0x354   : > { %1271 = vpow2.f32 %v631_v24  ;;  %v1234_v38 = vpop.permute.xlu0 %1233 }
 0x355   : > { %v1235_v26 = vunpack.i.l.bf16 %v1234_v38  ;;  %v1236_v27 = vunpack.i.h.bf16 %v1234_v38 }
 0x357   : > { %793 = vmatpush.msrb.mxu2 %v1235_v26 }
 0x358   : > { %v749_v28 = vpop.permute.xlu2 %748 }
 0x359   : > { %v752_v0 = vsub.f32 %v1707_v59, %v749_v28  ;;  %794 = vmatpush.msrb.mxu2 %v1236_v27  ;;  %v612_v59 = vsub.f32 %v1654_v21, %v1763_v20  ;;  %v613_v21 = vmul.f32 1.442695, %v611_v43 }
 0x35a   : > { %v1272_v31 = vpop.eup %1271  ;;  %1117 = vmatmul.msk.f32.vlgmr.msrb.gmra.mxu2 %vm358_vm3, %v1266_v3 }
 0x35b   : > { %v755_v29 = vmul.f32 1.442695, %v752_v0  ;;  %1112 = vmatmul.msk.f32.gmra.mxu3 %vm358_vm3, %v1272_v31  ;;  %v615_v36 = vmul.f32 1.442695, %v612_v59  ;;  %v638_v45 = vsel %vm358_vm3, %v1272_v31, 0.0 }
 0x35c   : > { %v1811_v41 = vpop.permute.xlu0 %556 }
 0x35d   : > { %1273 = vpow2.f32 %v755_v29 }
 0x35e   : > { %1275 = vpow2.f32 %v615_v36 }
 0x35f   : > { %1277 = vpow2.f32 %v613_v21 }
 0x363   : > { %v1274_v2 = vpop.eup %1273 }
 0x364   : > { %1118 = vmatmul.msk.f32.gmra.mxu2 %vm358_vm3, %v1274_v2  ;;  %v762_v34 = vsel %vm358_vm3, %v1274_v2, 0.0  ;;  %v1276_v39 = vpop.eup %1275  ;;  %v1813_v42 = vpop.permute.xlu0 %561 }
 0x365   : > { %763 = vadd.xlane.f32.xlu2 %v762_v34  ;;  %v1278_v49 = vpop.eup %1277  ;;  %v634_v15 = vmul.f32 %v1276_v39, %v1791_v6  ;;  %v833_v43 = vsel %vm322_vm0, %v1782_v50, %v1813_v42 }
 0x366   : > { %v633_v18 = vmul.f32 %v1278_v49, %v320_v48 }
 0x373   : > { %636 = vadd.xlane.f32.xlu0 %v635_v35 }
 0x39a   : > { %v514_v11 = vpop.xlane.xlu2 %513 }
 0x39b   : > { %v516_v14 = vadd.f32 %v514_v11, %v508_v13 }
 0x39d   : > { %v825_v38 = vsel %vm812_vm4, %v1795_v10, %v516_v14  ;;  %v839_v10 = vld [vmem:[#allocation5] sm:$0xff] }
 0x3a5   : > { %v551_v37 = vpop.f32.mrf.mxu3 }
 0x3a6   : > { %847 = vrot.lane.b32.xlu1 %v551_v37, %s1472_s4 }
 0x3a8   : > { %v761_v44 = vpop.xlane.xlu0 %760 }
 0x3a9   : > { %v765_v3 = vadd.f32 %v761_v44, %v757_v57 }
 0x3ae   : > { %685 = vperm.xlu1 %1239, %v1276_v39  }
 0x3b6   : > { %1240 = vset.pattern.permute.xlu1 %v1466_v16  ;;  %v511_v16 = vpop.xlane.xlu1 %510 }
 0x3b7   : > { %v515_v56 = vadd.f32 %v511_v16, %v507_v51 }
 0x3b9   : > { %v824_v1 = vsel %vm812_vm4, %v397_v32, %v515_v56 }
 0x3bb   : > { %v1818_v47 = vpop.permute.xlu0 %804 }
 0x3be   : > { %v810_v55 = vpop.permute.xlu1 %809 }
 0x3c6   : > { %v846_v8 = vpop.permute.xlu1 %845 }
 0x3c7   : > { %v867_v34 = vsel %vm322_vm0, %v1709_v60, %v846_v8 }
 0x3d6   : > { %v672_v33 = vpop.f32.mrf.mxu3 }
 0x3d8   : > { %639 = vadd.xlane.f32.xlu1 %v638_v45  ;;  %v764_v19 = vpop.xlane.xlu2 %763  ;;  %v840_v45 = vld [vmem:[#allocation5 + $0x8] sm:$0xff] }
 0x3dd   : > { %v796_v20 = vpop.f32.mrf.mxu2 }
 0x3de   : > { %861 = vrot.lane.b32.xlu2 %v796_v20, %s1473_s19  ;;  %v675_v5 = vpop.f32.mrf.mxu3 }
 0x3e6   : > { %680 = vperm.xlu2 %1238, %v1278_v49   ;;  %v637_v58 = vpop.xlane.xlu0 %636 }
 0x3e7   : > { %v641_v61 = vadd.f32 %v637_v58, %v633_v18  ;;  %v799_v63 = vpop.f32.mrf.mxu2 }
 0x3e8   : > { %863 = vrot.lane.b32.xlu0 %v799_v63, %s1473_s19 }
 0x3e9   : > { %v826_v53 = vsel %vm815_vm5, %v824_v1, %v641_v61 }
 0x3ea   : > { %v828_v4 = vsel %vm818_vm6, %v826_v53, %v765_v3 }
 0x3eb   : > { %830 = vst.msk [vmem:[#allocation4] sm:$0xff] %vm305_vm2, %v828_v4 }
 0x3f1   : > { %853 = vrot.lane.b32.xlu1 %v672_v33, %s1474_s21 }
 0x3f2   : > { %v881_v30 = vld [vmem:[#allocation4] sm:$0xff] }
 0x3f3   : > { %1279 = vrcp.f32 %v881_v30 }
 0x3f9   : > { %v1280_v25 = vpop.eup %1279 }
 0x3fa   : > { %904 = vperm.xlu2 %1238, %v1280_v25   ;;  %887 = vperm.xlu1 %1240, %v1280_v25  }
 0x402   : > { %1241 = vset.pattern.permute.xlu1 %v1469_v52  ;;  %1245 = vset.pattern.permute.xlu2 %v1470_v7  ;;  %v758_v52 = vmul.f32 %v1774_v46, %v1791_v6  ;;  %v832_v46 = vsel %vm322_vm0, %v1779_v23, %v1811_v41 }
 0x403   : > { %896 = vperm.xlu1 %1241, %v1280_v25  }
 0x404   : > { %v766_v26 = vadd.f32 %v764_v19, %v758_v52 }
 0x40b   : > { %855 = vrot.lane.b32.xlu1 %v675_v5, %s1474_s21 }
 0x418   : > { %v848_v9 = vpop.permute.xlu1 %847 }
 0x420   : > { %v686_v12 = vpop.permute.xlu1 %685 }
 0x421   : > { %v835_v44 = vsel %vm358_vm3, %v833_v43, %v686_v12 }
 0x422   : > { %v838_v21 = vsel %vm836_vm7, %v835_v44, %v810_v55 }
 0x438   : > { %v862_v40 = vpop.permute.xlu2 %861 }
 0x440   : > { %v681_v31 = vpop.permute.xlu2 %680 }
 0x441   : > { %v834_v29 = vsel %vm358_vm3, %v832_v46, %v681_v31 }
 0x442   : > { %v837_v2 = vsel %vm836_vm7, %v834_v29, %v1818_v47  ;;  %v842_v47 = vmul.f32 %v840_v45, %v838_v21 }
 0x443   : > { %v841_v59 = vmul.f32 %v839_v10, %v837_v2 }
 0x44b   : > { %v640_v22 = vpop.xlane.xlu1 %639 }
 0x44c   : > { %v642_v24 = vadd.f32 %v640_v22, %v634_v15 }
 0x44e   : > { %v827_v27 = vsel %vm815_vm5, %v825_v38, %v642_v24 }
 0x44f   : > { %v829_v28 = vsel %vm818_vm6, %v827_v27, %v766_v26 }
 0x450   : > { %831 = vst.msk [vmem:[#allocation4 + $0x8] sm:$0xff] %vm305_vm2, %v829_v28 }
 0x454   : > { %v905_v51 = vpop.permute.xlu2 %904 }
 0x457   : > { %v882_v0 = vld [vmem:[#allocation4 + $0x8] sm:$0xff] }
 0x458   : > { %1281 = vrcp.f32 %v882_v0 }
 0x45e   : > { %v1282_v6 = vpop.eup %1281 }
 0x45f   : > { %916 = vperm.xlu2 %1245, %v1282_v6   ;;  %900 = vperm.xlu1 %1241, %v1282_v6  }
 0x460   : > { %892 = vperm.xlu0 %1242, %v1282_v6  }
 0x463   : > { %v854_v35 = vpop.permute.xlu1 %853 }
 0x464   : > { %v869_v36 = vsel %vm358_vm3, %v867_v34, %v854_v35 }
 0x465   : > { %v871_v23 = vsel %vm836_vm7, %v869_v36, %v862_v40 }
 0x466   : > { %v873_v37 = vadd.f32 %v871_v23, %v841_v59 }
 0x467   : > { %1244 = vset.pattern.permute.xlu1 %v1470_v7 }
 0x468   : > { %876 = vst.msk [vmem:[#allocation5] sm:$0xff] %vm302_vm1, %v873_v37  ;;  %1243 = vset.pattern.permute.xlu0 %v1471_v17  ;;  %912 = vperm.xlu1 %1244, %v1280_v25   ;;  %v868_v17 = vsel %vm322_vm0, %v1713_v62, %v848_v9 }
 0x469   : > { %908 = vperm.xlu0 %1243, %v1282_v6  }
 0x46c   : > { %v888_v39 = vpop.permute.xlu1 %887 }
 0x46f   : > { %v919_v18 = vld [vmem:[#allocation5] sm:$0xff] }
 0x471   : > { %1246 = vset.pattern.permute.xlu0 %v1470_v7  ;;  %v864_v7 = vpop.permute.xlu0 %863 }
 0x475   : > { %v897_v41 = vpop.permute.xlu1 %896 }
 0x476   : > { %v921_v60 = vsel %vm322_vm0, %v888_v39, %v897_v41 }
 0x477   : > { %v923_v62 = vsel %vm358_vm3, %v921_v60, %v905_v51 }
 0x47d   : > { %v856_v20 = vpop.permute.xlu1 %855 }
 0x47e   : > { %v870_v48 = vsel %vm358_vm3, %v868_v17, %v856_v20 }
 0x47f   : > { %v872_v16 = vsel %vm836_vm7, %v870_v48, %v864_v7 }
 0x480   : > { %v874_v49 = vadd.f32 %v872_v16, %v842_v47 }
 0x482   : > { %877 = vst.msk [vmem:[#allocation5 + $0x8] sm:$0xff] %vm302_vm1, %v874_v49 }
 0x489   : > { %v920_v1 = vld [vmem:[#allocation5 + $0x8] sm:$0xff] }
 0x4b9   : > { %v917_v58 = vpop.permute.xlu2 %916 }
 0x4d1   : > { %v901_v50 = vpop.permute.xlu1 %900 }
 0x4d2   : > { %v893_v42 = vpop.permute.xlu0 %892 }
 0x4d3   : > { %v922_v56 = vsel %vm322_vm0, %v893_v42, %v901_v50 }
 0x4da   : > { %v913_v54 = vpop.permute.xlu1 %912 }
 0x4db   : > { %v925_v32 = vsel %vm836_vm7, %v923_v62, %v913_v54  ;;  %v909_v57 = vpop.permute.xlu0 %908 }
 0x4dc   : > { %v927_v61 = vmul.f32 %v925_v32, %v919_v18  ;;  %v924_v63 = vsel %vm358_vm3, %v922_v56, %v909_v57 }
 0x4dd   : > { %v926_v3 = vsel %vm836_vm7, %v924_v63, %v917_v58 }
 0x4de   : > { %929 = vst.msk [vmem:[%s291_s8] sm:$0xff] %vm302_vm1, %v927_v61  ;;  %v928_v53 = vmul.f32 %v926_v3, %v920_v1 }
 0x4e0   : > { %930 = vst.msk [vmem:[%s291_s8 + $0x8] sm:$0xff] %vm302_vm1, %v928_v53 }
 0x4e1   : > { %1400 = shalt.err (!%p1397_p13)
}
 0x4e2   : > { %s1475_s1 = smov 128  }
 0x4e3   : > { %1134 = dma.vmem_to_hbm [thread:$0]  (%p1551_p9), %s945_s10, 256, %s947_s5, %s932_s15, %s1475_s1, %s1475_s1, %s1472_s4  }
 0x4e4 PF: > { %s1933_s26 = sld [smem:[#allocation18_spill]]  ;;  %s961_s29 = sand.u32 1, %s1439_s12  }
 0x4e5   : > { %p1147_p0 = pnand %p1080_p12, %p1558_p11  ;;  %s962_s18 = scalar_lea.sflag [#allocation8], %s961_s29 }
 0x4e7   : > { %p1148_p1 = pneg %p1147_p0 }
 0x4e9   : > { %1434 = dma.done.wait (%p1148_p1), %s962_s18, 256  }
 0x4ea   : > { %1436 = vsyncadd (%p1148_p1), %s962_s18, 4294967040  ;;  %s22_s17 = sadd.s32 1, %s1933_s26   ;;  %s1934_s24 = sld [smem:[#allocation16_spill]] }
 0x4eb   : > { %p19_p2 = scmp.ge.s32.totalorder %s22_s17, 4   ;;  %s1935_s14 = sld [smem:[#allocation20_spill]] }
 0x4ec   : > { %s1936_s15 = sld [smem:[#allocation17_spill]]  ;;  %s1938_s12 = smov %s1443_s13 }
 0x4ed   : > { %s1937_s16 = sld [smem:[#allocation19_spill]]  ;;  %21 = sbr.rel (!%p19_p2) target bundleno = 10 (0xa), region = 109 }
 0x4f0   : > { %s1939_s13 = smov %s1934_s24 }
 0x4f2   :  { %968 = vsyncpa [#allocation7], 1 }
 0x4f3   :  { %970 = vsyncpa [#allocation7 + $0x1], 1 }
 0x4f4   :  { %971 = vsyncpa [#allocation10], 1 }
 0x4f5   :  { %973 = vsyncpa [#allocation10 + $0x1], 1 }
 0x4f6   :  { %974 = vsyncpa [#allocation8], 1 }
 0x4f7   :  { %976 = vsyncpa [#allocation8 + $0x1], 1 }

</bundles_post_ra>
